<compile_context>
chip_gen: v6e
topology: v6e:2x2x1
jax: 0.10.0
libtpu: 0.0.40
codegen_flags: <defaults>
</compile_context>

<pallas_src>
import jax
import jax.numpy as jnp
from jax.experimental import pallas as pl
from jax.experimental.pallas import tpu as pltpu  # noqa: F401  (kept for TPU backend)


# ----------------------------- configuration -----------------------------
CONFIG = dict(
    lstm_input_dim=16,
    lstm_hidden_dim=32,
    lstm_output_dim=32,
    task_model_dic={
        "task_a": {"output_dim": 8, "activation": "sigmoid"},
        "task_b": {"output_dim": 16, "activation": None},
    },
)
BN_EPS = 1e-5
SUBLANE = 8
LANE = 128


def _round_up(x, m):
    return -(-x // m) * m


# --------------------------- fused forward kernel ---------------------------
def make_fused_kernel(T, Bp, D, H, segments):
    """segments: static list of (lane_offset, dim, activation) per task."""
    need_sigmoid = any(a == "sigmoid" for _, _, a in segments)
    need_tanh = any(a == "tanh" for _, _, a in segments)

    def kernel(x_ref, wih_ref, whh_ref, lstm_b_ref,
               w1_ref, b1_ref, w2_ref, b2_ref,
               wh_ref, bh_ref, out_ref):
        # ---- LSTM ----
        # x_ref is time-major and pre-flattened to (T*Bp, D) by the wrapper, so
        # the non-recurrent input projection is one big matmul.
        xg = (jnp.dot(x_ref[...], wih_ref[...], preferred_element_type=jnp.float32)
              + lstm_b_ref[...])                                      # (T*Bp, 4H)
        whh = whh_ref[...]                                            # (H, 4H)
        h = jnp.zeros((Bp, H), jnp.float32)
        c = jnp.zeros((Bp, H), jnp.float32)
        # T is small and static: fully unrolled recurrence inside one kernel.
        for t in range(T):
            gates = xg[t * Bp:(t + 1) * Bp, :] + jnp.dot(
                h, whh, preferred_element_type=jnp.float32)           # (Bp, 4H)
            # Two full-vreg transcendentals instead of four narrow ones.
            sg = jax.nn.sigmoid(gates)
            tg = jnp.tanh(gates)
            i = sg[:, 0:H]          # PyTorch gate order: i, f, g, o
            f = sg[:, H:2 * H]
            g = tg[:, 2 * H:3 * H]
            o = sg[:, 3 * H:4 * H]
            c = f * c + i * g
            h = o * jnp.tanh(c)

        # ---- MLP head: linear+BN(eval) folded into a single affine, then ReLU ----
        z = jnp.maximum(
            jnp.dot(h, w1_ref[...], preferred_element_type=jnp.float32) + b1_ref[...],
            0.0)
        z = jnp.maximum(
            jnp.dot(z, w2_ref[...], preferred_element_type=jnp.float32) + b2_ref[...],
            0.0)

        # ---- all task heads as one lane-packed, lane-padded matmul ----
        y = jnp.dot(z, wh_ref[...], preferred_element_type=jnp.float32) + bh_ref[...]
        res = y
        lane = jax.lax.broadcasted_iota(jnp.int32, y.shape, 1)
        sig_y = jax.nn.sigmoid(y) if need_sigmoid else None
        tanh_y = jnp.tanh(y) if need_tanh else None
        for off, dim, act in segments:
            if act == "sigmoid":
                res = jnp.where((lane >= off) & (lane < off + dim), sig_y, res)
            elif act == "tanh":
                res = jnp.where((lane >= off) & (lane < off + dim), tanh_y, res)
        out_ref[...] = res

    return kernel


def my_models_forward(x, params, config):
    B, T, D = x.shape
    H = config["lstm_hidden_dim"]
    task_names = list(config["task_model_dic"].keys())

    # Static per-task lane segments in the packed head output.
    segments, off = [], 0
    for k in task_names:
        od = config["task_model_dic"][k]["output_dim"]
        segments.append((off, od, config["task_model_dic"][k]["activation"]))
        off += od

    Bp = _round_up(max(B, SUBLANE), SUBLANE)
    out_pad = params["w_heads"].shape[1]

    # Layout plumbing only: pad batch to sublane width, go time-major, flatten.
    xp = jnp.pad(x, ((0, Bp - B), (0, 0), (0, 0)))
    x_tm = jnp.transpose(xp, (1, 0, 2)).reshape(T * Bp, D)

    kernel = make_fused_kernel(T, Bp, D, H, segments)
    y = pl.pallas_call(
        kernel,
        out_shape=jax.ShapeDtypeStruct((Bp, out_pad), jnp.float32),
    )(x_tm,
      params["w_ih_t"], params["w_hh_t"], params["lstm_bias"],
      params["w1f_t"], params["b1f"], params["w2f_t"], params["b2f"],
      params["w_heads"], params["b_heads"])

    return {k: y[:B, o:o + d] for k, (o, d, _) in zip(task_names, segments)}


# ----------------------------- parameter init ------------------------------
def init_params(key, config):
    D = config["lstm_input_dim"]
    H = config["lstm_hidden_dim"]
    O = config["lstm_output_dim"]

    def uniform(key, shape, fan_in):
        bound = 1.0 / jnp.sqrt(jnp.float32(fan_in))
        return jax.random.uniform(key, shape, jnp.float32, -bound, bound)

    n_task = len(config["task_model_dic"])
    keys = jax.random.split(key, 8 + 2 * n_task)
    p = {}

    # LSTM (PyTorch layout (4H, D)/(4H, H)); pre-transpose for x @ W.
    w_ih = uniform(keys[0], (4 * H, D), H)
    w_hh = uniform(keys[1], (4 * H, H), H)
    b_ih = uniform(keys[2], (4 * H,), H)
    b_hh = uniform(keys[3], (4 * H,), H)
    p["w_ih_t"] = w_ih.T                       # (D, 4H)
    p["w_hh_t"] = w_hh.T                       # (H, 4H)
    p["lstm_bias"] = (b_ih + b_hh)[None, :]    # (1, 4H)

    # linear1 / linear2 (raw, for the pure-JAX reference path)
    w1 = uniform(keys[4], (O, H), H)
    b1 = uniform(keys[5], (O,), H)
    w2 = uniform(keys[6], (O, O), O)
    b2 = uniform(keys[7], (O,), O)
    p["w1_t"], p["b1"] = w1.T, b1[None, :]
    p["w2_t"], p["b2"] = w2.T, b2[None, :]

    # BatchNorm (eval mode; fresh PyTorch init: gamma=1, beta=0, mean=0, var=1)
    for name in ("bn1", "bn2"):
        gamma = jnp.ones((O,), jnp.float32)
        beta = jnp.zeros((O,), jnp.float32)
        r_mean = jnp.zeros((O,), jnp.float32)
        r_var = jnp.ones((O,), jnp.float32)
        scale = gamma / jnp.sqrt(r_var + BN_EPS)
        shift = beta - r_mean * scale
        p[f"{name}_scale"] = scale[None, :]
        p[f"{name}_shift"] = shift[None, :]

    # BN folded into the linear weights (exact in eval mode) -> kernel params.
    p["w1f_t"] = p["w1_t"] * p["bn1_scale"]
    p["b1f"] = p["b1"] * p["bn1_scale"] + p["bn1_shift"]
    p["w2f_t"] = p["w2_t"] * p["bn2_scale"]
    p["b2f"] = p["b2"] * p["bn2_scale"] + p["bn2_shift"]

    # Task heads: raw per-task params + one concatenated, lane-padded slab.
    kidx, total = 8, 0
    head_ws, head_bs = [], []
    for k, v in config["task_model_dic"].items():
        od = v["output_dim"]
        w = uniform(keys[kidx], (od, O), O)
        b = uniform(keys[kidx + 1], (od,), O)
        p[f"{k}_w_t"], p[f"{k}_b"] = w.T, b[None, :]
        head_ws.append(w.T)
        head_bs.append(b)
        total += od
        kidx += 2
    out_pad = _round_up(max(total, LANE), LANE)
    w_heads = jnp.concatenate(head_ws, axis=1)        # (O, total)
    b_heads = jnp.concatenate(head_bs, axis=0)        # (total,)
    p["w_heads"] = jnp.pad(w_heads, ((0, 0), (0, out_pad - total)))
    p["b_heads"] = jnp.pad(b_heads, ((0, out_pad - total),))[None, :]
    return p


# ---------------------------- pure-JAX reference -----------------------------
def reference_forward(x, p, config):
    B, T, D = x.shape
    H = config["lstm_hidden_dim"]
    h = jnp.zeros((B, H), jnp.float32)
    c = jnp.zeros((B, H), jnp.float32)
    for t in range(T):
        gates = x[:, t, :] @ p["w_ih_t"] + h @ p["w_hh_t"] + p["lstm_bias"]
        i = jax.nn.sigmoid(gates[:, 0:H])
        f = jax.nn.sigmoid(gates[:, H:2 * H])
        g = jnp.tanh(gates[:, 2 * H:3 * H])
        o = jax.nn.sigmoid(gates[:, 3 * H:4 * H])
        c = f * c + i * g
        h = o * jnp.tanh(c)
    z = jnp.maximum((h @ p["w1_t"] + p["b1"]) * p["bn1_scale"] + p["bn1_shift"], 0.0)
    z = jnp.maximum((z @ p["w2_t"] + p["b2"]) * p["bn2_scale"] + p["bn2_shift"], 0.0)
    out = {}
    for k, v in config["task_model_dic"].items():
        y = z @ p[f"{k}_w_t"] + p[f"{k}_b"]
        if v["activation"] == "sigmoid":
            y = jax.nn.sigmoid(y)
        elif v["activation"] == "tanh":
            y = jnp.tanh(y)
        out[k] = y
    return out


# ----------------------------------- main ------------------------------------
if __name__ == "__main__":
    key = jax.random.PRNGKey(0)
    k_param, k_x = jax.random.split(key)

    B, T = 4, 8
    x = jax.random.normal(k_x, (B, T, CONFIG["lstm_input_dim"]), jnp.float32)
    params = init_params(k_param, CONFIG)

    out = my_models_forward(x, params, CONFIG)
    out = jax.tree_util.tree_map(jax.block_until_ready, out)

    ref = reference_forward(x, params, CONFIG)
    for k in CONFIG["task_model_dic"]:
        assert out[k].shape == ref[k].shape, (k, out[k].shape, ref[k].shape)
        assert jnp.allclose(out[k], ref[k], atol=1e-5, rtol=1e-5), f"mismatch for {k}"

    print("KERNEL_OK")
</pallas_src>

<mosaic_0001>
module attributes {stable_mosaic.version = 11 : i64} {
  func.func @kernel(%arg0: memref<64x16xf32, #tpu.memory_space<vmem>>, %arg1: memref<16x128xf32, #tpu.memory_space<vmem>>, %arg2: memref<32x128xf32, #tpu.memory_space<vmem>>, %arg3: memref<1x128xf32, #tpu.memory_space<vmem>>, %arg4: memref<32x32xf32, #tpu.memory_space<vmem>>, %arg5: memref<1x32xf32, #tpu.memory_space<vmem>>, %arg6: memref<32x32xf32, #tpu.memory_space<vmem>>, %arg7: memref<1x32xf32, #tpu.memory_space<vmem>>, %arg8: memref<32x128xf32, #tpu.memory_space<vmem>>, %arg9: memref<1x128xf32, #tpu.memory_space<vmem>>, %arg10: memref<8x128xf32, #tpu.memory_space<vmem>>) attributes {dimension_semantics = [], scalar_prefetch = 0 : i64, scratch_operands = 0 : i64, tpu.core_type = #tpu.core_type<tc>} {
    %c0 = arith.constant 0 : index
    %c0_0 = arith.constant 0 : index
    %0 = vector.load %arg0[%c0, %c0_0] : memref<64x16xf32, #tpu.memory_space<vmem>>, vector<64x16xf32>
    %c0_1 = arith.constant 0 : index
    %c0_2 = arith.constant 0 : index
    %1 = vector.load %arg1[%c0_1, %c0_2] : memref<16x128xf32, #tpu.memory_space<vmem>>, vector<16x128xf32>
    %cst = arith.constant dense<0.000000e+00> : vector<64x128xf32>
    %2 = tpu.matmul %0, %1, %cst {dimension_numbers = #tpu.dot_dimension_numbers<[1], [0], [0], [1], [0, 0, 1, 1], [], []>} : vector<64x16xf32>, vector<16x128xf32>, vector<64x128xf32> -> vector<64x128xf32>
    %c0_3 = arith.constant 0 : index
    %c0_4 = arith.constant 0 : index
    %3 = vector.load %arg3[%c0_3, %c0_4] : memref<1x128xf32, #tpu.memory_space<vmem>>, vector<1x128xf32>
    %4 = vector.broadcast %3 : vector<1x128xf32> to vector<64x128xf32>
    %5 = arith.addf %2, %4 : vector<64x128xf32>
    %c0_5 = arith.constant 0 : index
    %c0_6 = arith.constant 0 : index
    %6 = vector.load %arg2[%c0_5, %c0_6] : memref<32x128xf32, #tpu.memory_space<vmem>>, vector<32x128xf32>
    %cst_7 = arith.constant 0.000000e+00 : f32
    %7 = vector.broadcast %cst_7 : f32 to vector<8x32xf32>
    %cst_8 = arith.constant 0.000000e+00 : f32
    %8 = vector.broadcast %cst_8 : f32 to vector<8x32xf32>
    %9 = vector.extract_strided_slice %5 {offsets = [0, 0], sizes = [8, 128], strides = [1, 1]} : vector<64x128xf32> to vector<8x128xf32>
    %cst_9 = arith.constant dense<0.000000e+00> : vector<8x128xf32>
    %10 = tpu.matmul %7, %6, %cst_9 {dimension_numbers = #tpu.dot_dimension_numbers<[1], [0], [0], [1], [0, 0, 1, 1], [], []>} : vector<8x32xf32>, vector<32x128xf32>, vector<8x128xf32> -> vector<8x128xf32>
    %11 = arith.addf %9, %10 : vector<8x128xf32>
    %12 = arith.negf %11 : vector<8x128xf32>
    %13 = math.exp %12 : vector<8x128xf32>
    %cst_10 = arith.constant 1.000000e+00 : f32
    %14 = vector.broadcast %cst_10 : f32 to vector<8x128xf32>
    %15 = arith.addf %14, %13 : vector<8x128xf32>
    %16 = arith.divf %14, %15 : vector<8x128xf32>
    %17 = math.tanh %11 : vector<8x128xf32>
    %18 = vector.extract_strided_slice %16 {offsets = [0, 0], sizes = [8, 32], strides = [1, 1]} : vector<8x128xf32> to vector<8x32xf32>
    %19 = vector.extract_strided_slice %16 {offsets = [0, 32], sizes = [8, 32], strides = [1, 1]} : vector<8x128xf32> to vector<8x32xf32>
    %20 = vector.extract_strided_slice %17 {offsets = [0, 64], sizes = [8, 32], strides = [1, 1]} : vector<8x128xf32> to vector<8x32xf32>
    %21 = vector.extract_strided_slice %16 {offsets = [0, 96], sizes = [8, 32], strides = [1, 1]} : vector<8x128xf32> to vector<8x32xf32>
    %22 = arith.mulf %19, %8 : vector<8x32xf32>
    %23 = arith.mulf %18, %20 : vector<8x32xf32>
    %24 = arith.addf %22, %23 : vector<8x32xf32>
    %25 = math.tanh %24 : vector<8x32xf32>
    %26 = arith.mulf %21, %25 : vector<8x32xf32>
    %27 = vector.extract_strided_slice %5 {offsets = [8, 0], sizes = [8, 128], strides = [1, 1]} : vector<64x128xf32> to vector<8x128xf32>
    %cst_11 = arith.constant dense<0.000000e+00> : vector<8x128xf32>
    %28 = tpu.matmul %26, %6, %cst_11 {dimension_numbers = #tpu.dot_dimension_numbers<[1], [0], [0], [1], [0, 0, 1, 1], [], []>} : vector<8x32xf32>, vector<32x128xf32>, vector<8x128xf32> -> vector<8x128xf32>
    %29 = arith.addf %27, %28 : vector<8x128xf32>
    %30 = arith.negf %29 : vector<8x128xf32>
    %31 = math.exp %30 : vector<8x128xf32>
    %cst_12 = arith.constant 1.000000e+00 : f32
    %32 = vector.broadcast %cst_12 : f32 to vector<8x128xf32>
    %33 = arith.addf %32, %31 : vector<8x128xf32>
    %34 = arith.divf %32, %33 : vector<8x128xf32>
    %35 = math.tanh %29 : vector<8x128xf32>
    %36 = vector.extract_strided_slice %34 {offsets = [0, 0], sizes = [8, 32], strides = [1, 1]} : vector<8x128xf32> to vector<8x32xf32>
    %37 = vector.extract_strided_slice %34 {offsets = [0, 32], sizes = [8, 32], strides = [1, 1]} : vector<8x128xf32> to vector<8x32xf32>
    %38 = vector.extract_strided_slice %35 {offsets = [0, 64], sizes = [8, 32], strides = [1, 1]} : vector<8x128xf32> to vector<8x32xf32>
    %39 = vector.extract_strided_slice %34 {offsets = [0, 96], sizes = [8, 32], strides = [1, 1]} : vector<8x128xf32> to vector<8x32xf32>
    %40 = arith.mulf %37, %24 : vector<8x32xf32>
    %41 = arith.mulf %36, %38 : vector<8x32xf32>
    %42 = arith.addf %40, %41 : vector<8x32xf32>
    %43 = math.tanh %42 : vector<8x32xf32>
    %44 = arith.mulf %39, %43 : vector<8x32xf32>
    %45 = vector.extract_strided_slice %5 {offsets = [16, 0], sizes = [8, 128], strides = [1, 1]} : vector<64x128xf32> to vector<8x128xf32>
    %cst_13 = arith.constant dense<0.000000e+00> : vector<8x128xf32>
    %46 = tpu.matmul %44, %6, %cst_13 {dimension_numbers = #tpu.dot_dimension_numbers<[1], [0], [0], [1], [0, 0, 1, 1], [], []>} : vector<8x32xf32>, vector<32x128xf32>, vector<8x128xf32> -> vector<8x128xf32>
    %47 = arith.addf %45, %46 : vector<8x128xf32>
    %48 = arith.negf %47 : vector<8x128xf32>
    %49 = math.exp %48 : vector<8x128xf32>
    %cst_14 = arith.constant 1.000000e+00 : f32
    %50 = vector.broadcast %cst_14 : f32 to vector<8x128xf32>
    %51 = arith.addf %50, %49 : vector<8x128xf32>
    %52 = arith.divf %50, %51 : vector<8x128xf32>
    %53 = math.tanh %47 : vector<8x128xf32>
    %54 = vector.extract_strided_slice %52 {offsets = [0, 0], sizes = [8, 32], strides = [1, 1]} : vector<8x128xf32> to vector<8x32xf32>
    %55 = vector.extract_strided_slice %52 {offsets = [0, 32], sizes = [8, 32], strides = [1, 1]} : vector<8x128xf32> to vector<8x32xf32>
    %56 = vector.extract_strided_slice %53 {offsets = [0, 64], sizes = [8, 32], strides = [1, 1]} : vector<8x128xf32> to vector<8x32xf32>
    %57 = vector.extract_strided_slice %52 {offsets = [0, 96], sizes = [8, 32], strides = [1, 1]} : vector<8x128xf32> to vector<8x32xf32>
    %58 = arith.mulf %55, %42 : vector<8x32xf32>
    %59 = arith.mulf %54, %56 : vector<8x32xf32>
    %60 = arith.addf %58, %59 : vector<8x32xf32>
    %61 = math.tanh %60 : vector<8x32xf32>
    %62 = arith.mulf %57, %61 : vector<8x32xf32>
    %63 = vector.extract_strided_slice %5 {offsets = [24, 0], sizes = [8, 128], strides = [1, 1]} : vector<64x128xf32> to vector<8x128xf32>
    %cst_15 = arith.constant dense<0.000000e+00> : vector<8x128xf32>
    %64 = tpu.matmul %62, %6, %cst_15 {dimension_numbers = #tpu.dot_dimension_numbers<[1], [0], [0], [1], [0, 0, 1, 1], [], []>} : vector<8x32xf32>, vector<32x128xf32>, vector<8x128xf32> -> vector<8x128xf32>
    %65 = arith.addf %63, %64 : vector<8x128xf32>
    %66 = arith.negf %65 : vector<8x128xf32>
    %67 = math.exp %66 : vector<8x128xf32>
    %cst_16 = arith.constant 1.000000e+00 : f32
    %68 = vector.broadcast %cst_16 : f32 to vector<8x128xf32>
    %69 = arith.addf %68, %67 : vector<8x128xf32>
    %70 = arith.divf %68, %69 : vector<8x128xf32>
    %71 = math.tanh %65 : vector<8x128xf32>
    %72 = vector.extract_strided_slice %70 {offsets = [0, 0], sizes = [8, 32], strides = [1, 1]} : vector<8x128xf32> to vector<8x32xf32>
    %73 = vector.extract_strided_slice %70 {offsets = [0, 32], sizes = [8, 32], strides = [1, 1]} : vector<8x128xf32> to vector<8x32xf32>
    %74 = vector.extract_strided_slice %71 {offsets = [0, 64], sizes = [8, 32], strides = [1, 1]} : vector<8x128xf32> to vector<8x32xf32>
    %75 = vector.extract_strided_slice %70 {offsets = [0, 96], sizes = [8, 32], strides = [1, 1]} : vector<8x128xf32> to vector<8x32xf32>
    %76 = arith.mulf %73, %60 : vector<8x32xf32>
    %77 = arith.mulf %72, %74 : vector<8x32xf32>
    %78 = arith.addf %76, %77 : vector<8x32xf32>
    %79 = math.tanh %78 : vector<8x32xf32>
    %80 = arith.mulf %75, %79 : vector<8x32xf32>
    %81 = vector.extract_strided_slice %5 {offsets = [32, 0], sizes = [8, 128], strides = [1, 1]} : vector<64x128xf32> to vector<8x128xf32>
    %cst_17 = arith.constant dense<0.000000e+00> : vector<8x128xf32>
    %82 = tpu.matmul %80, %6, %cst_17 {dimension_numbers = #tpu.dot_dimension_numbers<[1], [0], [0], [1], [0, 0, 1, 1], [], []>} : vector<8x32xf32>, vector<32x128xf32>, vector<8x128xf32> -> vector<8x128xf32>
    %83 = arith.addf %81, %82 : vector<8x128xf32>
    %84 = arith.negf %83 : vector<8x128xf32>
    %85 = math.exp %84 : vector<8x128xf32>
    %cst_18 = arith.constant 1.000000e+00 : f32
    %86 = vector.broadcast %cst_18 : f32 to vector<8x128xf32>
    %87 = arith.addf %86, %85 : vector<8x128xf32>
    %88 = arith.divf %86, %87 : vector<8x128xf32>
    %89 = math.tanh %83 : vector<8x128xf32>
    %90 = vector.extract_strided_slice %88 {offsets = [0, 0], sizes = [8, 32], strides = [1, 1]} : vector<8x128xf32> to vector<8x32xf32>
    %91 = vector.extract_strided_slice %88 {offsets = [0, 32], sizes = [8, 32], strides = [1, 1]} : vector<8x128xf32> to vector<8x32xf32>
    %92 = vector.extract_strided_slice %89 {offsets = [0, 64], sizes = [8, 32], strides = [1, 1]} : vector<8x128xf32> to vector<8x32xf32>
    %93 = vector.extract_strided_slice %88 {offsets = [0, 96], sizes = [8, 32], strides = [1, 1]} : vector<8x128xf32> to vector<8x32xf32>
    %94 = arith.mulf %91, %78 : vector<8x32xf32>
    %95 = arith.mulf %90, %92 : vector<8x32xf32>
    %96 = arith.addf %94, %95 : vector<8x32xf32>
    %97 = math.tanh %96 : vector<8x32xf32>
    %98 = arith.mulf %93, %97 : vector<8x32xf32>
    %99 = vector.extract_strided_slice %5 {offsets = [40, 0], sizes = [8, 128], strides = [1, 1]} : vector<64x128xf32> to vector<8x128xf32>
    %cst_19 = arith.constant dense<0.000000e+00> : vector<8x128xf32>
    %100 = tpu.matmul %98, %6, %cst_19 {dimension_numbers = #tpu.dot_dimension_numbers<[1], [0], [0], [1], [0, 0, 1, 1], [], []>} : vector<8x32xf32>, vector<32x128xf32>, vector<8x128xf32> -> vector<8x128xf32>
    %101 = arith.addf %99, %100 : vector<8x128xf32>
    %102 = arith.negf %101 : vector<8x128xf32>
    %103 = math.exp %102 : vector<8x128xf32>
    %cst_20 = arith.constant 1.000000e+00 : f32
    %104 = vector.broadcast %cst_20 : f32 to vector<8x128xf32>
    %105 = arith.addf %104, %103 : vector<8x128xf32>
    %106 = arith.divf %104, %105 : vector<8x128xf32>
    %107 = math.tanh %101 : vector<8x128xf32>
    %108 = vector.extract_strided_slice %106 {offsets = [0, 0], sizes = [8, 32], strides = [1, 1]} : vector<8x128xf32> to vector<8x32xf32>
    %109 = vector.extract_strided_slice %106 {offsets = [0, 32], sizes = [8, 32], strides = [1, 1]} : vector<8x128xf32> to vector<8x32xf32>
    %110 = vector.extract_strided_slice %107 {offsets = [0, 64], sizes = [8, 32], strides = [1, 1]} : vector<8x128xf32> to vector<8x32xf32>
    %111 = vector.extract_strided_slice %106 {offsets = [0, 96], sizes = [8, 32], strides = [1, 1]} : vector<8x128xf32> to vector<8x32xf32>
    %112 = arith.mulf %109, %96 : vector<8x32xf32>
    %113 = arith.mulf %108, %110 : vector<8x32xf32>
    %114 = arith.addf %112, %113 : vector<8x32xf32>
    %115 = math.tanh %114 : vector<8x32xf32>
    %116 = arith.mulf %111, %115 : vector<8x32xf32>
    %117 = vector.extract_strided_slice %5 {offsets = [48, 0], sizes = [8, 128], strides = [1, 1]} : vector<64x128xf32> to vector<8x128xf32>
    %cst_21 = arith.constant dense<0.000000e+00> : vector<8x128xf32>
    %118 = tpu.matmul %116, %6, %cst_21 {dimension_numbers = #tpu.dot_dimension_numbers<[1], [0], [0], [1], [0, 0, 1, 1], [], []>} : vector<8x32xf32>, vector<32x128xf32>, vector<8x128xf32> -> vector<8x128xf32>
    %119 = arith.addf %117, %118 : vector<8x128xf32>
    %120 = arith.negf %119 : vector<8x128xf32>
    %121 = math.exp %120 : vector<8x128xf32>
    %cst_22 = arith.constant 1.000000e+00 : f32
    %122 = vector.broadcast %cst_22 : f32 to vector<8x128xf32>
    %123 = arith.addf %122, %121 : vector<8x128xf32>
    %124 = arith.divf %122, %123 : vector<8x128xf32>
    %125 = math.tanh %119 : vector<8x128xf32>
    %126 = vector.extract_strided_slice %124 {offsets = [0, 0], sizes = [8, 32], strides = [1, 1]} : vector<8x128xf32> to vector<8x32xf32>
    %127 = vector.extract_strided_slice %124 {offsets = [0, 32], sizes = [8, 32], strides = [1, 1]} : vector<8x128xf32> to vector<8x32xf32>
    %128 = vector.extract_strided_slice %125 {offsets = [0, 64], sizes = [8, 32], strides = [1, 1]} : vector<8x128xf32> to vector<8x32xf32>
    %129 = vector.extract_strided_slice %124 {offsets = [0, 96], sizes = [8, 32], strides = [1, 1]} : vector<8x128xf32> to vector<8x32xf32>
    %130 = arith.mulf %127, %114 : vector<8x32xf32>
    %131 = arith.mulf %126, %128 : vector<8x32xf32>
    %132 = arith.addf %130, %131 : vector<8x32xf32>
    %133 = math.tanh %132 : vector<8x32xf32>
    %134 = arith.mulf %129, %133 : vector<8x32xf32>
    %135 = vector.extract_strided_slice %5 {offsets = [56, 0], sizes = [8, 128], strides = [1, 1]} : vector<64x128xf32> to vector<8x128xf32>
    %cst_23 = arith.constant dense<0.000000e+00> : vector<8x128xf32>
    %136 = tpu.matmul %134, %6, %cst_23 {dimension_numbers = #tpu.dot_dimension_numbers<[1], [0], [0], [1], [0, 0, 1, 1], [], []>} : vector<8x32xf32>, vector<32x128xf32>, vector<8x128xf32> -> vector<8x128xf32>
    %137 = arith.addf %135, %136 : vector<8x128xf32>
    %138 = arith.negf %137 : vector<8x128xf32>
    %139 = math.exp %138 : vector<8x128xf32>
    %cst_24 = arith.constant 1.000000e+00 : f32
    %140 = vector.broadcast %cst_24 : f32 to vector<8x128xf32>
    %141 = arith.addf %140, %139 : vector<8x128xf32>
    %142 = arith.divf %140, %141 : vector<8x128xf32>
    %143 = math.tanh %137 : vector<8x128xf32>
    %144 = vector.extract_strided_slice %142 {offsets = [0, 0], sizes = [8, 32], strides = [1, 1]} : vector<8x128xf32> to vector<8x32xf32>
    %145 = vector.extract_strided_slice %142 {offsets = [0, 32], sizes = [8, 32], strides = [1, 1]} : vector<8x128xf32> to vector<8x32xf32>
    %146 = vector.extract_strided_slice %143 {offsets = [0, 64], sizes = [8, 32], strides = [1, 1]} : vector<8x128xf32> to vector<8x32xf32>
    %147 = vector.extract_strided_slice %142 {offsets = [0, 96], sizes = [8, 32], strides = [1, 1]} : vector<8x128xf32> to vector<8x32xf32>
    %148 = arith.mulf %145, %132 : vector<8x32xf32>
    %149 = arith.mulf %144, %146 : vector<8x32xf32>
    %150 = arith.addf %148, %149 : vector<8x32xf32>
    %151 = math.tanh %150 : vector<8x32xf32>
    %152 = arith.mulf %147, %151 : vector<8x32xf32>
    %c0_25 = arith.constant 0 : index
    %c0_26 = arith.constant 0 : index
    %153 = vector.load %arg4[%c0_25, %c0_26] : memref<32x32xf32, #tpu.memory_space<vmem>>, vector<32x32xf32>
    %cst_27 = arith.constant dense<0.000000e+00> : vector<8x32xf32>
    %154 = tpu.matmul %152, %153, %cst_27 {dimension_numbers = #tpu.dot_dimension_numbers<[1], [0], [0], [1], [0, 0, 1, 1], [], []>} : vector<8x32xf32>, vector<32x32xf32>, vector<8x32xf32> -> vector<8x32xf32>
    %c0_28 = arith.constant 0 : index
    %c0_29 = arith.constant 0 : index
    %155 = vector.load %arg5[%c0_28, %c0_29] : memref<1x32xf32, #tpu.memory_space<vmem>>, vector<1x32xf32>
    %156 = vector.broadcast %155 : vector<1x32xf32> to vector<8x32xf32>
    %157 = arith.addf %154, %156 : vector<8x32xf32>
    %cst_30 = arith.constant 0.000000e+00 : f32
    %158 = vector.broadcast %cst_30 : f32 to vector<8x32xf32>
    %159 = arith.maximumf %157, %158 : vector<8x32xf32>
    %c0_31 = arith.constant 0 : index
    %c0_32 = arith.constant 0 : index
    %160 = vector.load %arg6[%c0_31, %c0_32] : memref<32x32xf32, #tpu.memory_space<vmem>>, vector<32x32xf32>
    %cst_33 = arith.constant dense<0.000000e+00> : vector<8x32xf32>
    %161 = tpu.matmul %159, %160, %cst_33 {dimension_numbers = #tpu.dot_dimension_numbers<[1], [0], [0], [1], [0, 0, 1, 1], [], []>} : vector<8x32xf32>, vector<32x32xf32>, vector<8x32xf32> -> vector<8x32xf32>
    %c0_34 = arith.constant 0 : index
    %c0_35 = arith.constant 0 : index
    %162 = vector.load %arg7[%c0_34, %c0_35] : memref<1x32xf32, #tpu.memory_space<vmem>>, vector<1x32xf32>
    %163 = vector.broadcast %162 : vector<1x32xf32> to vector<8x32xf32>
    %164 = arith.addf %161, %163 : vector<8x32xf32>
    %cst_36 = arith.constant 0.000000e+00 : f32
    %165 = vector.broadcast %cst_36 : f32 to vector<8x32xf32>
    %166 = arith.maximumf %164, %165 : vector<8x32xf32>
    %c0_37 = arith.constant 0 : index
    %c0_38 = arith.constant 0 : index
    %167 = vector.load %arg8[%c0_37, %c0_38] : memref<32x128xf32, #tpu.memory_space<vmem>>, vector<32x128xf32>
    %cst_39 = arith.constant dense<0.000000e+00> : vector<8x128xf32>
    %168 = tpu.matmul %166, %167, %cst_39 {dimension_numbers = #tpu.dot_dimension_numbers<[1], [0], [0], [1], [0, 0, 1, 1], [], []>} : vector<8x32xf32>, vector<32x128xf32>, vector<8x128xf32> -> vector<8x128xf32>
    %c0_40 = arith.constant 0 : index
    %c0_41 = arith.constant 0 : index
    %169 = vector.load %arg9[%c0_40, %c0_41] : memref<1x128xf32, #tpu.memory_space<vmem>>, vector<1x128xf32>
    %170 = vector.broadcast %169 : vector<1x128xf32> to vector<8x128xf32>
    %171 = arith.addf %168, %170 : vector<8x128xf32>
    %172 = tpu.iota {dimensions = array<i32: 1>} : vector<8x128xi32>
    %173 = arith.negf %171 : vector<8x128xf32>
    %174 = math.exp %173 : vector<8x128xf32>
    %cst_42 = arith.constant 1.000000e+00 : f32
    %175 = vector.broadcast %cst_42 : f32 to vector<8x128xf32>
    %176 = arith.addf %175, %174 : vector<8x128xf32>
    %177 = arith.divf %175, %176 : vector<8x128xf32>
    %c0_i32 = arith.constant 0 : i32
    %178 = vector.broadcast %c0_i32 : i32 to vector<8x128xi32>
    %179 = arith.cmpi sge, %172, %178 : vector<8x128xi32>
    %c8_i32 = arith.constant 8 : i32
    %180 = vector.broadcast %c8_i32 : i32 to vector<8x128xi32>
    %181 = arith.cmpi slt, %172, %180 : vector<8x128xi32>
    %182 = arith.andi %179, %181 : vector<8x128xi1>
    %183 = arith.select %182, %177, %171 : vector<8x128xi1>, vector<8x128xf32>
    %c0_43 = arith.constant 0 : index
    %c0_44 = arith.constant 0 : index
    %184 = vector.load %arg10[%c0_43, %c0_44] : memref<8x128xf32, #tpu.memory_space<vmem>>, vector<8x128xf32>
    tpu.vector_store %arg10[%c0_43, %c0_44], %183 {strides = array<i32>} : memref<8x128xf32, #tpu.memory_space<vmem>>, vector<8x128xf32>,
    return
  }
}

</mosaic_0001>

<bundles_post_ra>
// kernel: tpu_custom_call.1
= control target key start
LH: loop header
LB: loop body
LE: loop exit
PB: predicated region body
PF: predicated region fallthrough
CT: control target
= control target key end

     0   :  { %15 = vsyncpa [#allocation3], 0  ;;  %s1993_s0 = inlined_call_operand.vmem [shape: f32[64,16], index: 0, kind: input, shape index: {}]   ;;  %s1994_s1 = inlined_call_operand.vmem [shape: f32[16,128], index: 1, kind: input, shape index: {}]   ;;  %s1995_s2 = inlined_call_operand.vmem [shape: f32[32,128], index: 2, kind: input, shape index: {}]   ;;  %s1996_s3 = inlined_call_operand.vmem [shape: f32[1,128], index: 3, kind: input, shape index: {}]   ;;  %s1997_s4 = inlined_call_operand.vmem [shape: f32[32,32], index: 4, kind: input, shape index: {}]   ;;  %s1998_s5 = inlined_call_operand.vmem [shape: f32[1,32], index: 5, kind: input, shape index: {}]   ;;  %s1999_s6 = inlined_call_operand.hbm [shape: f32[32,32], index: 6, kind: input, shape index: {}]   ;;  %s2000_s7 = inlined_call_operand.vmem [shape: f32[1,32], index: 7, kind: input, shape index: {}]   ;;  %s2001_s8 = inlined_call_operand.hbm [shape: f32[32,128], index: 8, kind: input, shape index: {}]   ;;  %s2002_s9 = inlined_call_operand.vmem [shape: f32[1,128], index: 9, kind: input, shape index: {}]   ;;  %s2003_s10 = inlined_call_operand.hbm [shape: f32[8,128], index: 10, kind: output, shape index: {}]  }
   0x1   :  { %16 = vsyncpa [#allocation6], 0 }
   0x2   :  { %17 = vsyncpa [#allocation4], 0  ;;  %s1675_s13 = smov [#allocation2]  }
   0x3   :  { %s35_s14 = sshll.u32 %s1675_s13, 4  ;;  %s36_s14 = int_to_ptr.vmem [resolvable:$true] %s35_s14 }
   0x4   :  { %s1617_s15 = scalar_lea.vmem %s36_s14, 512  ;;  %p1622_p1 = scmp.lt.s32.totalorder %s36_s14, %s36_s14 }
   0x5   :  { %p1618_p0 = scmp.ne.s32.totalorder %s36_s14, %s1617_s15  ;;  %p1623_p2 = scmp.lt.s32.totalorder %s1617_s15, %s1617_s15 }
   0x7   :  { %p1624_p3 = por %p1623_p2, %p1622_p1 }
   0x9   :  { %p1625_p4 = pnand %p1624_p3, %p1618_p0 }
   0xb   :  { %1628 = shalt.err (!%p1625_p4)
}
   0xc   :  { %s1676_s16 = smov 128   ;;  %s1677_s17 = smov 8  }
   0xd   :  { %41 = dma.hbm_to_vmem [thread:$0]  %s1999_s6, 512, %s36_s14, [#allocation3], %s1676_s16, %s1676_s16, %s1677_s17  }
   0xe   :  { %s1678_s20 = smov [#allocation5]  }
   0xf   :  { %s49_s21 = sshll.u32 %s1678_s20, 4  ;;  %s50_s21 = int_to_ptr.vmem [resolvable:$true] %s49_s21 }
  0x10   :  { %s1637_s22 = scalar_lea.vmem %s50_s21, 512  ;;  %p1642_p6 = scmp.lt.s32.totalorder %s50_s21, %s50_s21 }
  0x11   :  { %p1638_p5 = scmp.ne.s32.totalorder %s50_s21, %s1637_s22  ;;  %p1643_p7 = scmp.lt.s32.totalorder %s1637_s22, %s1637_s22 }
  0x13   :  { %p1644_p8 = por %p1643_p7, %p1642_p6 }
  0x15   :  { %p1645_p9 = pnand %p1644_p8, %p1638_p5 }
  0x17   :  { %1648 = shalt.err (!%p1645_p9)
}
  0x18   :  { %55 = dma.hbm_to_vmem [thread:$0]  %s2001_s8, 512, %s50_s21, [#allocation6], %s1676_s16, %s1676_s16, %s1677_s17  }
  0x19   :  { %1669 = dma.done.wait [#allocation3], 512  }
  0x1a   :  { %1670 = vsyncadd [#allocation3], 4294966784 }
  0x1b   :  { %1671 = dma.done.wait [#allocation6], 512  }
  0x1c   :  { %1672 = vsyncadd [#allocation6], 4294966784  ;;  %v1679_v0 = vmov 0.0   ;;  %vm1680_vm0 = vmmov 0   ;;  %v73_v1 = vld [vmem:[%s1994_s1 + $0x8] sm:$0xff]  ;;  %v1754_v2 = vld [vmem:[%s1995_s2 + $0x18] sm:$0xff] }
  0x1d   :  { %1411 = vmatprep.subr.mxu1 %v1679_v0  ;;  %1419 = vmatprep.mubr.msk.f32.mxu1 %vm1680_vm0, %v1679_v0  ;;  %v72_v3 = vld [vmem:[%s1994_s1] sm:$0xff]  ;;  %v1763_v4 = vld [vmem:[%s1995_s2 + $0x10] sm:$0xff]  ;;  %vm81_vm1 = vcmask 130048   ;;  %v65_v6 = vld [vmem:[%s1993_s0 + $0x8] sm:$0xff]  ;;  %s1681_s19 = smov 64   ;;  %vm215_vm2 = vcmask 261120  }
  0x1e   :  { %1395 = vmatprep.subr.mxu0 %v73_v1  ;;  %1412 = vmatpush3.msra.mxu1 %v1754_v2  ;;  %v64_v5 = vld [vmem:[%s1993_s0] sm:$0xff]  ;;  %v1776_v7 = vld [vmem:[%s1995_s2 + $0x8] sm:$0xff]  ;;  %v66_v44 = vld [vmem:[%s1993_s0 + $0x10] sm:$0xff] }
  0x1f   :  { %1396 = vmatpush3.msra.mxu0 %v73_v1  ;;  %1413 = vmatprep.subr.mxu1 %v1679_v0  ;;  %v1784_v8 = vld [vmem:[%s1995_s2] sm:$0xff]  ;;  %v67_v45 = vld [vmem:[%s1993_s0 + $0x18] sm:$0xff]  ;;  %v69_v47 = vld [vmem:[%s1993_s0 + $0x28] sm:$0xff] }
  0x20   :  { %1397 = vmatprep.subr.mxu0 %v72_v3  ;;  %1414 = vmatpush3.msra.mxu1 %v1763_v4  ;;  %v1813_v10 = vld [vmem:[%s1996_s3] ss:$0 sm:$0xff]  ;;  %s1682_s3 = smov 32   ;;  %v70_v48 = vld [vmem:[%s1993_s0 + $0x30] sm:$0xff]  ;;  %v71_v49 = vld [vmem:[%s1993_s0 + $0x38] sm:$0xff] }
  0x21   :  { %1398 = vmatpush3.msra.mxu0 %v72_v3  ;;  %1399 = vmatprep.mubr.msk.f32.mxu0 %vm81_vm1, %v64_v5  ;;  %v68_v46 = vld [vmem:[%s1993_s0 + $0x20] sm:$0xff] }
  0x22   :  { %1415 = vmatprep.subr.mxu1 %v1679_v0  ;;  %1400 = vmatmul.mubr.msk.f32.vlgmr.msra.gmra.mxu0 %vm81_vm1, %v65_v6 }
  0x23   :  { %1416 = vmatpush3.msra.mxu1 %v1776_v7  ;;  %1433 = vmatprep.subr.mxu0 %v1679_v0 }
  0x24   :  { %1417 = vmatprep.subr.mxu1 %v1679_v0  ;;  %1434 = vmatpush3.msra.mxu0 %v1754_v2 }
  0x25   :  { %1418 = vmatpush3.msra.mxu1 %v1784_v8  ;;  %1435 = vmatprep.subr.mxu0 %v1679_v0 }
  0x26   :  { %1420 = vmatmul.mubr.f32.vlgmr.msra.gmra.mxu1 %v1679_v0  ;;  %1422 = vmatprep.subr.mxu1 %v1679_v0 }
  0x27   :  { %1423 = vmatpush3.msra.mxu1 %v1754_v2  ;;  %1430 = vmatprep.mubr.msk.f32.mxu1 %vm1680_vm0, %v1679_v0 }
  0x28   :  { %1424 = vmatprep.subr.mxu1 %v1679_v0  ;;  %1436 = vmatpush3.msra.mxu0 %v1763_v4 }
  0x29   :  { %1425 = vmatpush3.msra.mxu1 %v1763_v4  ;;  %1437 = vmatprep.subr.mxu0 %v1679_v0 }
  0x2a   :  { %1426 = vmatprep.subr.mxu1 %v1679_v0  ;;  %1438 = vmatpush3.msra.mxu0 %v1776_v7 }
  0x2b   :  { %1427 = vmatpush3.msra.mxu1 %v1776_v7  ;;  %1439 = vmatprep.subr.mxu0 %v1679_v0 }
  0x2c   :  { %1428 = vmatprep.subr.mxu1 %v1679_v0  ;;  %1440 = vmatpush3.msra.mxu0 %v1784_v8 }
  0x2d   :  { %1429 = vmatpush3.msra.mxu1 %v1784_v8  ;;  %1455 = vmatprep.subr.mxu0 %v1679_v0 }
  0x2e   :  { %1444 = vmatprep.subr.mxu1 %v1679_v0  ;;  %1402 = vmatprep.mubr.msk.f32.mxu0 %vm81_vm1, %v66_v44 }
  0x2f   :  { %1403 = vmatmul.mubr.msk.f32.gmra.mxu0 %vm81_vm1, %v67_v45 }
  0x30   :  { %1405 = vmatprep.mubr.msk.f32.mxu0 %vm81_vm1, %v68_v46 }
  0x33   :  { %1406 = vmatmul.mubr.msk.f32.gmra.mxu0 %vm81_vm1, %v69_v47 }
  0x34   :  { %1408 = vmatprep.mubr.msk.f32.mxu0 %vm81_vm1, %v70_v48 }
  0x37   :  { %1409 = vmatmul.mubr.msk.f32.gmra.mxu0 %vm81_vm1, %v71_v49 }
  0x38   :  { %1441 = vmatprep.mubr.msk.f32.mxu0 %vm1680_vm0, %v1679_v0 }
  0xe2   :  { %v1401_v9 = vpop.f32.mrf.mxu0 }
  0xe3   :  { %v178_v30 = vadd.f32 %v1401_v9, %v1813_v10 }
  0xe4   :  { %v172_v11 = vpop.f32.mrf.mxu0 }
  0xe5   :  { %v173_v12 = vadd.f32 %v1813_v10, %v172_v11 }
  0xe6   :  { %v285_v13 = vpop.f32.mrf.mxu1 }
  0xe7   :  { %v289_v14 = vadd.f32 %v285_v13, %v173_v12 }
  0xe8   :  { %v1421_v15 = vpop.f32.mrf.mxu1 }
  0xe9   :  { %1541 = vtanh.f32 %v289_v14  ;;  %v1308_v17 = vmul.f32 -1.442695, %v289_v14 }
  0xeb   :  { %1543 = vpow2.f32 %v1308_v17 }
  0xef   :  { %v1404_v54 = vpop.f32.mrf.mxu0 }
  0xf1   :  { %v182_v55 = vpop.f32.mrf.mxu0 }
  0xf2   :  { %v183_v60 = vadd.f32 %v1813_v10, %v182_v55 }
  0xf3   :  { %v1873_v56 = vpop.f32.mrf.mxu0 }
  0xf5   :  { %v1875_v57 = vpop.f32.mrf.mxu0 }
  0xf6   :  { %v1542_v16 = vpop.eup %1541 }
  0xf7   :  { %299 = vrot.lane.b32.xlu0 %v1542_v16, %s1681_s19  ;;  %v1877_v58 = vpop.f32.mrf.mxu0 }
  0xf8   :  { %v1544_v18 = vpop.eup %1543 }
  0xf9   :  { %v293_v19 = vadd.f32 1.0, %v1544_v18  ;;  %v1879_v59 = vpop.f32.mrf.mxu0 }
  0xfb   :  { %1545 = vrcp.f32 %v293_v19 }
 0x108   :  { %v1546_v20 = vpop.eup %1545 }
 0x109   :  { %v297_v23 = vmul.f32 0.0, %v1546_v20 }
 0x169   :  { %v300_v21 = vpop.permute.xlu0 %299 }
 0x16a   :  { %v302_v22 = vmul.f32 %v1546_v20, %v300_v21 }
 0x16c   :  { %304 = vrot.lane.b32.xlu0 %v302_v22, %s1682_s3 }
 0x1de   :  { %v305_v24 = vpop.permute.xlu0 %304 }
 0x1df   :  { %v307_v25 = vadd.f32 %v305_v24, %v297_v23 }
 0x1e1   :  { %1547 = vtanh.f32 %v307_v25 }
 0x1ee   :  { %v1548_v26 = vpop.eup %1547 }
 0x1ef   :  { %310 = vrot.lane.b32.xlu1 %v1548_v26, %s1681_s19 }
 0x261   :  { %v311_v27 = vpop.permute.xlu1 %310 }
 0x262   :  { %v313_v28 = vmul.f32 %v1546_v20, %v311_v27  ;;  %v188_v20 = vadd.f32 %v1404_v54, %v1813_v10 }
 0x264   :  { %315 = vrot.lane.b32.xlu1 %v313_v28, %s1682_s3 }
 0x2d6   :  { %v316_v29 = vpop.permute.xlu1 %315 }
 0x2d7   :  { %1431 = vmatmul.mubr.msk.f32.vlgmr.msra.gmra.mxu1 %vm215_vm2, %v316_v29 }
 0x2d8   :  { %1445 = vmatpush3.msra.mxu1 %v1754_v2  ;;  %1452 = vmatprep.mubr.msk.f32.mxu1 %vm1680_vm0, %v1679_v0 }
 0x2d9   :  { %1446 = vmatprep.subr.mxu1 %v1679_v0 }
 0x2da   :  { %1447 = vmatpush3.msra.mxu1 %v1763_v4 }
 0x2db   :  { %1448 = vmatprep.subr.mxu1 %v1679_v0 }
 0x2dc   :  { %1449 = vmatpush3.msra.mxu1 %v1776_v7 }
 0x2dd   :  { %1450 = vmatprep.subr.mxu1 %v1679_v0 }
 0x2de   :  { %1451 = vmatpush3.msra.mxu1 %v1784_v8 }
 0x2df   :  { %1466 = vmatprep.subr.mxu1 %v1679_v0 }
 0x397   :  { %v385_v31 = vpop.f32.mrf.mxu1 }
 0x398   :  { %v389_v32 = vadd.f32 %v385_v31, %v178_v30 }
 0x399   :  { %v1432_v33 = vpop.f32.mrf.mxu1 }
 0x39a   :  { %1549 = vtanh.f32 %v389_v32  ;;  %v1310_v35 = vmul.f32 -1.442695, %v389_v32 }
 0x39c   :  { %1551 = vpow2.f32 %v1310_v35 }
 0x3a7   :  { %v1550_v34 = vpop.eup %1549 }
 0x3a8   :  { %399 = vrot.lane.b32.xlu0 %v1550_v34, %s1681_s19 }
 0x3a9   :  { %v1552_v36 = vpop.eup %1551 }
 0x3aa   :  { %v393_v37 = vadd.f32 1.0, %v1552_v36 }
 0x3ac   :  { %1553 = vrcp.f32 %v393_v37 }
 0x3b9   :  { %v1554_v38 = vpop.eup %1553 }
 0x3ba   :  { %v397_v41 = vmul.f32 %v1554_v38, %v307_v25 }
 0x41a   :  { %v400_v39 = vpop.permute.xlu0 %399 }
 0x41b   :  { %v402_v40 = vmul.f32 %v1554_v38, %v400_v39 }
 0x41d   :  { %404 = vrot.lane.b32.xlu1 %v402_v40, %s1682_s3 }
 0x48f   :  { %v405_v42 = vpop.permute.xlu1 %404 }
 0x490   :  { %v407_v43 = vadd.f32 %v405_v42, %v397_v41 }
 0x492   :  { %1555 = vtanh.f32 %v407_v43 }
 0x49f   :  { %v1556_v50 = vpop.eup %1555 }
 0x4a0   :  { %410 = vrot.lane.b32.xlu0 %v1556_v50, %s1681_s19 }
 0x512   :  { %v411_v51 = vpop.permute.xlu0 %410 }
 0x513   :  { %v413_v52 = vmul.f32 %v1554_v38, %v411_v51  ;;  %v193_v38 = vadd.f32 %v1813_v10, %v1875_v57 }
 0x515   :  { %415 = vrot.lane.b32.xlu1 %v413_v52, %s1682_s3 }
 0x587   :  { %v416_v53 = vpop.permute.xlu1 %415 }
 0x588   :  { %1442 = vmatmul.mubr.msk.f32.vlgmr.msra.gmra.mxu0 %vm215_vm2, %v416_v53 }
 0x589   :  { %1456 = vmatpush3.msra.mxu0 %v1754_v2  ;;  %1463 = vmatprep.mubr.msk.f32.mxu0 %vm1680_vm0, %v1679_v0 }
 0x58a   :  { %1457 = vmatprep.subr.mxu0 %v1679_v0 }
 0x58b   :  { %1458 = vmatpush3.msra.mxu0 %v1763_v4 }
 0x58c   :  { %1459 = vmatprep.subr.mxu0 %v1679_v0 }
 0x58d   :  { %1460 = vmatpush3.msra.mxu0 %v1776_v7 }
 0x58e   :  { %1461 = vmatprep.subr.mxu0 %v1679_v0 }
 0x58f   :  { %1462 = vmatpush3.msra.mxu0 %v1784_v8 }
 0x590   :  { %1477 = vmatprep.subr.mxu0 %v1679_v0 }
 0x648   :  { %v485_v61 = vpop.f32.mrf.mxu0 }
 0x649   :  { %v489_v62 = vadd.f32 %v485_v61, %v183_v60 }
 0x64a   :  { %v1443_v63 = vpop.f32.mrf.mxu0 }
 0x64b   :  { %1557 = vtanh.f32 %v489_v62  ;;  %v1312_v3 = vmul.f32 -1.442695, %v489_v62 }
 0x64d   :  { %1559 = vpow2.f32 %v1312_v3 }
 0x658   :  { %v1558_v1 = vpop.eup %1557 }
 0x659   :  { %499 = vrot.lane.b32.xlu0 %v1558_v1, %s1681_s19 }
 0x65a   :  { %v1560_v5 = vpop.eup %1559 }
 0x65b   :  { %v493_v6 = vadd.f32 1.0, %v1560_v5 }
 0x65d   :  { %1561 = vrcp.f32 %v493_v6 }
 0x66a   :  { %v1562_v9 = vpop.eup %1561 }
 0x66b   :  { %v497_v13 = vmul.f32 %v1562_v9, %v407_v43 }
 0x6cb   :  { %v500_v11 = vpop.permute.xlu0 %499 }
 0x6cc   :  { %v502_v12 = vmul.f32 %v1562_v9, %v500_v11 }
 0x6ce   :  { %504 = vrot.lane.b32.xlu1 %v502_v12, %s1682_s3 }
 0x740   :  { %v505_v14 = vpop.permute.xlu1 %504 }
 0x741   :  { %v507_v15 = vadd.f32 %v505_v14, %v497_v13  ;;  %v203_v14 = vadd.f32 %v1813_v10, %v1879_v59 }
 0x743   :  { %1563 = vtanh.f32 %v507_v15 }
 0x750   :  { %v1564_v16 = vpop.eup %1563 }
 0x751   :  { %510 = vrot.lane.b32.xlu0 %v1564_v16, %s1681_s19 }
 0x7c3   :  { %v511_v17 = vpop.permute.xlu0 %510 }
 0x7c4   :  { %v513_v18 = vmul.f32 %v1562_v9, %v511_v17 }
 0x7c6   :  { %515 = vrot.lane.b32.xlu1 %v513_v18, %s1682_s3 }
 0x838   :  { %v516_v19 = vpop.permute.xlu1 %515 }
 0x839   :  { %1453 = vmatmul.mubr.msk.f32.vlgmr.msra.gmra.mxu1 %vm215_vm2, %v516_v19 }
 0x83a   :  { %1467 = vmatpush3.msra.mxu1 %v1754_v2  ;;  %1474 = vmatprep.mubr.msk.f32.mxu1 %vm1680_vm0, %v1679_v0 }
 0x83b   :  { %1468 = vmatprep.subr.mxu1 %v1679_v0 }
 0x83c   :  { %1469 = vmatpush3.msra.mxu1 %v1763_v4 }
 0x83d   :  { %1470 = vmatprep.subr.mxu1 %v1679_v0 }
 0x83e   :  { %1471 = vmatpush3.msra.mxu1 %v1776_v7 }
 0x83f   :  { %1472 = vmatprep.subr.mxu1 %v1679_v0 }
 0x840   :  { %1473 = vmatpush3.msra.mxu1 %v1784_v8 }
 0x841   :  { %1488 = vmatprep.subr.mxu1 %v1679_v0 }
 0x8f9   :  { %v585_v21 = vpop.f32.mrf.mxu1 }
 0x8fa   :  { %v589_v22 = vadd.f32 %v585_v21, %v188_v20 }
 0x8fb   :  { %v1454_v23 = vpop.f32.mrf.mxu1 }
 0x8fc   :  { %1565 = vtanh.f32 %v589_v22  ;;  %v1314_v25 = vmul.f32 -1.442695, %v589_v22 }
 0x8fe   :  { %1567 = vpow2.f32 %v1314_v25 }
 0x909   :  { %v1566_v24 = vpop.eup %1565 }
 0x90a   :  { %599 = vrot.lane.b32.xlu0 %v1566_v24, %s1681_s19 }
 0x90b   :  { %v1568_v26 = vpop.eup %1567 }
 0x90c   :  { %v593_v27 = vadd.f32 1.0, %v1568_v26 }
 0x90e   :  { %1569 = vrcp.f32 %v593_v27 }
 0x91b   :  { %v1570_v28 = vpop.eup %1569 }
 0x91c   :  { %v597_v31 = vmul.f32 %v1570_v28, %v507_v15 }
 0x97c   :  { %v600_v29 = vpop.permute.xlu0 %599 }
 0x97d   :  { %v602_v30 = vmul.f32 %v1570_v28, %v600_v29 }
 0x97f   :  { %604 = vrot.lane.b32.xlu1 %v602_v30, %s1682_s3 }
 0x9f1   :  { %v605_v32 = vpop.permute.xlu1 %604 }
 0x9f2   :  { %v607_v33 = vadd.f32 %v605_v32, %v597_v31  ;;  %v208_v31 = vadd.f32 %v1877_v58, %v1813_v10  ;;  %v1017_v58 = vld [vmem:[%s1997_s4 + $0x18] sm:$0xff] }
 0x9f4   :  { %1571 = vtanh.f32 %v607_v33 }
 0xa01   :  { %v1572_v34 = vpop.eup %1571 }
 0xa02   :  { %610 = vrot.lane.b32.xlu0 %v1572_v34, %s1681_s19 }
 0xa74   :  { %v611_v35 = vpop.permute.xlu0 %610 }
 0xa75   :  { %v613_v36 = vmul.f32 %v1570_v28, %v611_v35 }
 0xa77   :  { %615 = vrot.lane.b32.xlu1 %v613_v36, %s1682_s3 }
 0xae9   :  { %v616_v37 = vpop.permute.xlu1 %615 }
 0xaea   :  { %1464 = vmatmul.mubr.msk.f32.vlgmr.msra.gmra.mxu0 %vm215_vm2, %v616_v37 }
 0xaeb   :  { %1478 = vmatpush3.msra.mxu0 %v1754_v2  ;;  %1485 = vmatprep.mubr.msk.f32.mxu0 %vm1680_vm0, %v1679_v0 }
 0xaec   :  { %1479 = vmatprep.subr.mxu0 %v1679_v0 }
 0xaed   :  { %1480 = vmatpush3.msra.mxu0 %v1763_v4 }
 0xaee   :  { %1481 = vmatprep.subr.mxu0 %v1679_v0 }
 0xaef   :  { %1482 = vmatpush3.msra.mxu0 %v1776_v7 }
 0xaf0   :  { %1483 = vmatprep.subr.mxu0 %v1679_v0 }
 0xaf1   :  { %1484 = vmatpush3.msra.mxu0 %v1784_v8 }
 0xaf2   :  { %1499 = vmatprep.subr.mxu0 %v1679_v0 }
 0xbaa   :  { %v685_v39 = vpop.f32.mrf.mxu0 }
 0xbab   :  { %v689_v40 = vadd.f32 %v685_v39, %v193_v38 }
 0xbac   :  { %v1465_v41 = vpop.f32.mrf.mxu0 }
 0xbad   :  { %1573 = vtanh.f32 %v689_v40  ;;  %v1316_v43 = vmul.f32 -1.442695, %v689_v40 }
 0xbaf   :  { %1575 = vpow2.f32 %v1316_v43 }
 0xbba   :  { %v1574_v42 = vpop.eup %1573 }
 0xbbb   :  { %699 = vrot.lane.b32.xlu0 %v1574_v42, %s1681_s19 }
 0xbbc   :  { %v1576_v44 = vpop.eup %1575 }
 0xbbd   :  { %v693_v45 = vadd.f32 1.0, %v1576_v44  ;;  %v1016_v44 = vld [vmem:[%s1997_s4 + $0x10] sm:$0xff] }
 0xbbf   :  { %1577 = vrcp.f32 %v693_v45  ;;  %v1015_v45 = vld [vmem:[%s1997_s4 + $0x8] sm:$0xff] }
 0xbcc   :  { %v1578_v46 = vpop.eup %1577 }
 0xbcd   :  { %v697_v49 = vmul.f32 %v1578_v46, %v607_v33 }
 0xc2d   :  { %v700_v47 = vpop.permute.xlu0 %699 }
 0xc2e   :  { %v702_v48 = vmul.f32 %v1578_v46, %v700_v47 }
 0xc30   :  { %704 = vrot.lane.b32.xlu1 %v702_v48, %s1682_s3  ;;  %v1104_v48 = vld [vmem:[#allocation2 + $0x18] sm:$0xff] }
 0xca2   :  { %v705_v50 = vpop.permute.xlu1 %704 }
 0xca3   :  { %v707_v51 = vadd.f32 %v705_v50, %v697_v49 }
 0xca5   :  { %1579 = vtanh.f32 %v707_v51 }
 0xcb2   :  { %v1580_v52 = vpop.eup %1579 }
 0xcb3   :  { %710 = vrot.lane.b32.xlu0 %v1580_v52, %s1681_s19  ;;  %v1103_v52 = vld [vmem:[#allocation2 + $0x10] sm:$0xff] }
 0xd25   :  { %v711_v53 = vpop.permute.xlu0 %710 }
 0xd26   :  { %v713_v54 = vmul.f32 %v1578_v46, %v711_v53  ;;  %v1014_v46 = vld [vmem:[%s1997_s4] sm:$0xff]  ;;  %v1102_v53 = vld [vmem:[#allocation2 + $0x8] sm:$0xff] }
 0xd28   :  { %715 = vrot.lane.b32.xlu1 %v713_v54, %s1682_s3  ;;  %v1101_v54 = vld [vmem:[#allocation2] sm:$0xff] }
 0xd9a   :  { %v716_v55 = vpop.permute.xlu1 %715 }
 0xd9b   :  { %1475 = vmatmul.mubr.msk.f32.vlgmr.msra.gmra.mxu1 %vm215_vm2, %v716_v55  ;;  %v1189_v55 = vld [vmem:[#allocation5 + $0x18] sm:$0xff] }
 0xd9c   :  { %1489 = vmatpush3.msra.mxu1 %v1754_v2  ;;  %1496 = vmatprep.mubr.msk.f32.mxu1 %vm1680_vm0, %v1679_v0  ;;  %v198_v2 = vadd.f32 %v1873_v56, %v1813_v10 }
 0xd9d   :  { %1490 = vmatprep.subr.mxu1 %v1679_v0 }
 0xd9e   :  { %1491 = vmatpush3.msra.mxu1 %v1763_v4 }
 0xd9f   :  { %1492 = vmatprep.subr.mxu1 %v1679_v0 }
 0xda0   :  { %1493 = vmatpush3.msra.mxu1 %v1776_v7 }
 0xda1   :  { %1494 = vmatprep.subr.mxu1 %v1679_v0 }
 0xda2   :  { %1495 = vmatpush3.msra.mxu1 %v1784_v8 }
 0xda3   :  { %1510 = vmatprep.subr.mxu1 %v1679_v0 }
 0xe5b   :  { %v785_v57 = vpop.f32.mrf.mxu1 }
 0xe5c   :  { %v789_v60 = vadd.f32 %v785_v57, %v198_v2  ;;  %v1323_v2 = vld [vmem:[%s1998_s5] ss:$0 sm:$0xff] }
 0xe5d   :  { %v1476_v61 = vpop.f32.mrf.mxu1 }
 0xe5e   :  { %1581 = vtanh.f32 %v789_v60  ;;  %v1318_v4 = vmul.f32 -1.442695, %v789_v60 }
 0xe60   :  { %1583 = vpow2.f32 %v1318_v4  ;;  %v1188_v4 = vld [vmem:[#allocation5 + $0x10] sm:$0xff] }
 0xe6b   :  { %v1582_v62 = vpop.eup %1581 }
 0xe6c   :  { %799 = vrot.lane.b32.xlu0 %v1582_v62, %s1681_s19 }
 0xe6d   :  { %v1584_v63 = vpop.eup %1583 }
 0xe6e   :  { %v793_v7 = vadd.f32 1.0, %v1584_v63  ;;  %v1187_v63 = vld [vmem:[#allocation5 + $0x8] sm:$0xff] }
 0xe70   :  { %1585 = vrcp.f32 %v793_v7  ;;  %v1186_v7 = vld [vmem:[#allocation5] sm:$0xff] }
 0xe7d   :  { %v1586_v1 = vpop.eup %1585 }
 0xe7e   :  { %v797_v5 = vmul.f32 %v1586_v1, %v707_v51 }
 0xede   :  { %v800_v3 = vpop.permute.xlu0 %799 }
 0xedf   :  { %v802_v8 = vmul.f32 %v1586_v1, %v800_v3 }
 0xee1   :  { %804 = vrot.lane.b32.xlu1 %v802_v8, %s1682_s3 }
 0xf53   :  { %v805_v6 = vpop.permute.xlu1 %804 }
 0xf54   :  { %v807_v56 = vadd.f32 %v805_v6, %v797_v5 }
 0xf56   :  { %1587 = vtanh.f32 %v807_v56 }
 0xf63   :  { %v1588_v9 = vpop.eup %1587 }
 0xf64   :  { %810 = vrot.lane.b32.xlu0 %v1588_v9, %s1681_s19 }
 0xfd6   :  { %v811_v11 = vpop.permute.xlu0 %810 }
 0xfd7   :  { %v813_v12 = vmul.f32 %v1586_v1, %v811_v11  ;;  %v1325_v1 = vld [vmem:[%s2000_s7] ss:$0 sm:$0xff]  ;;  %s1683_s7 = smov [#allocation7]  }
 0xfd9   :  { %815 = vrot.lane.b32.xlu1 %v813_v12, %s1682_s3 }
0x104b   :  { %v816_v13 = vpop.permute.xlu1 %815 }
0x104c   :  { %1486 = vmatmul.mubr.msk.f32.vlgmr.msra.gmra.mxu0 %vm215_vm2, %v816_v13 }
0x104d   :  { %1507 = vmatprep.mubr.msk.f32.mxu0 %vm1680_vm0, %v1679_v0  ;;  %1500 = vmatpush3.msra.mxu0 %v1017_v58 }
0x104e   :  { %1501 = vmatprep.subr.mxu0 %v1679_v0 }
0x104f   :  { %1502 = vmatpush3.msra.mxu0 %v1016_v44 }
0x1050   :  { %1503 = vmatprep.subr.mxu0 %v1679_v0 }
0x1051   :  { %1504 = vmatpush3.msra.mxu0 %v1015_v45 }
0x1052   :  { %1505 = vmatprep.subr.mxu0 %v1679_v0 }
0x1053   :  { %1506 = vmatpush3.msra.mxu0 %v1014_v46 }
0x1054   :  { %1521 = vmatprep.subr.mxu0 %v1679_v0 }
0x110c   :  { %v885_v15 = vpop.f32.mrf.mxu0 }
0x110d   :  { %v889_v16 = vadd.f32 %v885_v15, %v203_v14  ;;  %v1270_v15 = vlaneseq }
0x110e   :  { %v1487_v17 = vpop.f32.mrf.mxu0 }
0x110f   :  { %1589 = vtanh.f32 %v889_v16  ;;  %v1320_v19 = vmul.f32 -1.442695, %v889_v16  ;;  %v1271_v16 = vand.u32 127, %v1270_v15 }
0x1111   :  { %1591 = vpow2.f32 %v1320_v19  ;;  %vm1279_vm3 = vcmp.lt.s32.totalorder %v1271_v16, 8 }
0x111c   :  { %v1590_v18 = vpop.eup %1589 }
0x111d   :  { %899 = vrot.lane.b32.xlu0 %v1590_v18, %s1681_s19 }
0x111e   :  { %v1592_v20 = vpop.eup %1591 }
0x111f   :  { %v893_v21 = vadd.f32 1.0, %v1592_v20 }
0x1121   :  { %1593 = vrcp.f32 %v893_v21 }
0x112e   :  { %v1594_v22 = vpop.eup %1593 }
0x112f   :  { %v897_v25 = vmul.f32 %v1594_v22, %v807_v56  ;;  %v1327_v56 = vld [vmem:[%s2002_s9] ss:$0 sm:$0xff] }
0x118f   :  { %v900_v23 = vpop.permute.xlu0 %899 }
0x1190   :  { %v902_v24 = vmul.f32 %v1594_v22, %v900_v23 }
0x1192   :  { %904 = vrot.lane.b32.xlu1 %v902_v24, %s1682_s3 }
0x1204   :  { %v905_v26 = vpop.permute.xlu1 %904 }
0x1205   :  { %v907_v59 = vadd.f32 %v905_v26, %v897_v25 }
0x1207   :  { %1595 = vtanh.f32 %v907_v59 }
0x1214   :  { %v1596_v27 = vpop.eup %1595 }
0x1215   :  { %910 = vrot.lane.b32.xlu0 %v1596_v27, %s1681_s19 }
0x1287   :  { %v911_v28 = vpop.permute.xlu0 %910 }
0x1288   :  { %v913_v29 = vmul.f32 %v1594_v22, %v911_v28 }
0x128a   :  { %915 = vrot.lane.b32.xlu1 %v913_v29, %s1682_s3 }
0x12fc   :  { %v916_v30 = vpop.permute.xlu1 %915 }
0x12fd   :  { %1497 = vmatmul.mubr.msk.f32.vlgmr.msra.gmra.mxu1 %vm215_vm2, %v916_v30 }
0x12fe   :  { %1518 = vmatprep.mubr.msk.f32.mxu1 %vm1680_vm0, %v1679_v0  ;;  %1511 = vmatpush3.msra.mxu1 %v1104_v48 }
0x12ff   :  { %1512 = vmatprep.subr.mxu1 %v1679_v0 }
0x1300   :  { %1513 = vmatpush3.msra.mxu1 %v1103_v52 }
0x1301   :  { %1514 = vmatprep.subr.mxu1 %v1679_v0 }
0x1302   :  { %1515 = vmatpush3.msra.mxu1 %v1102_v53 }
0x1303   :  { %1516 = vmatprep.subr.mxu1 %v1679_v0 }
0x1304   :  { %1517 = vmatpush3.msra.mxu1 %v1101_v54 }
0x13bd   :  { %v985_v32 = vpop.f32.mrf.mxu1 }
0x13be   :  { %v989_v33 = vadd.f32 %v985_v32, %v208_v31 }
0x13bf   :  { %v1498_v34 = vpop.f32.mrf.mxu1 }
0x13c0   :  { %1597 = vtanh.f32 %v989_v33  ;;  %v1322_v36 = vmul.f32 -1.442695, %v989_v33 }
0x13c2   :  { %1599 = vpow2.f32 %v1322_v36 }
0x13cd   :  { %v1598_v35 = vpop.eup %1597 }
0x13ce   :  { %999 = vrot.lane.b32.xlu0 %v1598_v35, %s1681_s19 }
0x13cf   :  { %v1600_v37 = vpop.eup %1599 }
0x13d0   :  { %v993_v38 = vadd.f32 1.0, %v1600_v37 }
0x13d2   :  { %1601 = vrcp.f32 %v993_v38 }
0x13df   :  { %v1602_v39 = vpop.eup %1601 }
0x13e0   :  { %v997_v42 = vmul.f32 %v1602_v39, %v907_v59 }
0x1440   :  { %v1000_v40 = vpop.permute.xlu0 %999 }
0x1441   :  { %v1002_v41 = vmul.f32 %v1602_v39, %v1000_v40 }
0x1443   :  { %1004 = vrot.lane.b32.xlu1 %v1002_v41, %s1682_s3 }
0x14b5   :  { %v1005_v43 = vpop.permute.xlu1 %1004 }
0x14b6   :  { %v1007_v10 = vadd.f32 %v1005_v43, %v997_v42 }
0x14b8   :  { %1603 = vtanh.f32 %v1007_v10 }
0x14c5   :  { %v1604_v47 = vpop.eup %1603 }
0x14c6   :  { %1010 = vrot.lane.b32.xlu0 %v1604_v47, %s1681_s19  ;;  %s1289_s19 = sshll.u32 %s1683_s7, 4  ;;  %s1290_s19 = int_to_ptr.vmem [resolvable:$true] %s1289_s19 }
0x14c7   :  { %p1654_p11 = scmp.lt.s32.totalorder %s1290_s19, %s1290_s19 }
0x1538   :  { %v1011_v49 = vpop.permute.xlu0 %1010 }
0x1539   :  { %v1013_v50 = vmul.f32 %v1602_v39, %v1011_v49 }
0x153b   :  { %1026 = vrot.lane.b32.xlu1 %v1013_v50, %s1682_s3  ;;  %s1649_s3 = scalar_lea.vmem %s1290_s19, 128 }
0x153c   :  { %p1650_p10 = scmp.ne.s32.totalorder %s1290_s19, %s1649_s3  ;;  %p1655_p12 = scmp.lt.s32.totalorder %s1649_s3, %s1649_s3 }
0x153e   :  { %p1656_p13 = por %p1655_p12, %p1654_p11 }
0x1540   :  { %p1657_p0 = pnand %p1656_p13, %p1650_p10 }
0x15ad   :  { %v1027_v51 = vpop.permute.xlu1 %1026 }
0x15ae   :  { %1508 = vmatmul.mubr.msk.f32.vlgmr.msra.gmra.mxu0 %vm215_vm2, %v1027_v51 }
0x15af   :  { %1529 = vmatprep.mubr.msk.f32.mxu0 %vm1680_vm0, %v1679_v0  ;;  %1522 = vmatpush3.msra.mxu0 %v1189_v55 }
0x15b0   :  { %1523 = vmatprep.subr.mxu0 %v1679_v0 }
0x15b1   :  { %1524 = vmatpush3.msra.mxu0 %v1188_v4 }
0x15b2   :  { %1525 = vmatprep.subr.mxu0 %v1679_v0 }
0x15b3   :  { %1526 = vmatpush3.msra.mxu0 %v1187_v63 }
0x15b4   :  { %1527 = vmatprep.subr.mxu0 %v1679_v0 }
0x15b5   :  { %1528 = vmatpush3.msra.mxu0 %v1186_v7 }
0x166e   :  { %v1096_v57 = vpop.f32.mrf.mxu0 }
0x166f   :  { %v1097_v60 = vadd.f32 %v1323_v2, %v1096_v57 }
0x1670   :  { %v1509_v61 = vpop.f32.mrf.mxu0 }
0x1671   :  { %v1100_v62 = vmax.f32 %v1097_v60, 0.0 }
0x1673   :  { %1519 = vmatmul.mubr.msk.f32.vlgmr.msra.gmra.mxu1 %vm215_vm2, %v1100_v62 }
0x1733   :  { %v1181_v3 = vpop.f32.mrf.mxu1 }
0x1734   :  { %v1182_v8 = vadd.f32 %v1325_v1, %v1181_v3 }
0x1735   :  { %v1520_v5 = vpop.f32.mrf.mxu1 }
0x1736   :  { %v1185_v6 = vmax.f32 %v1182_v8, 0.0 }
0x1738   :  { %1530 = vmatmul.mubr.msk.f32.vlgmr.msra.gmra.mxu0 %vm215_vm2, %v1185_v6 }
0x17f8   :  { %v1266_v9 = vpop.f32.mrf.mxu0 }
0x17f9   :  { %v1267_v11 = vadd.f32 %v1327_v56, %v1266_v9 }
0x17fa   :  { %v1531_v12 = vpop.f32.mrf.mxu0 }
0x17fb   :  { %v1329_v13 = vmul.f32 -1.442695, %v1267_v11 }
0x17fd   :  { %1605 = vpow2.f32 %v1329_v13 }
0x180a   :  { %v1606_v0 = vpop.eup %1605 }
0x180b   :  { %v1275_v14 = vadd.f32 1.0, %v1606_v0 }
0x180d   :  { %1607 = vrcp.f32 %v1275_v14 }
0x181a   :  { %v1608_v17 = vpop.eup %1607 }
0x181b   :  { %v1281_v18 = vsel %vm1279_vm3, %v1608_v17, %v1267_v11 }
0x181c   :  { %1282 = vst [vmem:[#allocation7] sm:$0xff] %v1281_v18 }
0x181d   :  { %1660 = shalt.err (!%p1657_p0)
}
0x181e   :  { %1292 = dma.vmem_to_hbm [thread:$0]  %s1290_s19, 128, %s2003_s10, [#allocation4]  }
0x181f   :  { %1673 = dma.done.wait [#allocation4], 128  }
0x1820   :  { %1674 = vsyncadd [#allocation4], 4294967168 }
0x1821   :  { %1296 = vsyncpa [#allocation3], 1 }
0x1822   :  { %1297 = vsyncpa [#allocation6], 1 }
0x1823   :  { %1298 = vsyncpa [#allocation4], 1 }

</bundles_post_ra>
